<compile_context>
chip_gen: v5e
topology: v5e:2x2
jax: 0.10.0
libtpu: 0.0.40
codegen_flags: <defaults>
</compile_context>

<pallas_src>
import numpy as np
import jax
import jax.numpy as jnp
from jax.experimental import pallas as pl
from jax.experimental.pallas import tpu as pltpu


def cdrae_kernel(w0_ref, bnorm_ref, wl_ref, out_ref):
    # w0_ref    : (G, F, Hd)  VMEM block for this batch element
    # bnorm_ref : (G, F, F)   VMEM block for this batch element
    # wl_ref    : (batch, G)  whole array in SMEM (scalar reads)
    # out_ref   : (Hd, Hd)
    b = pl.program_id(0)
    G = w0_ref.shape[0]
    inv_g = 1.0 / G                                      # compile-time constant

    # ---- weight_feature = mean_g softmax(W_0, dim=2) -------------------------
    w0 = w0_ref[...]                                     # (G, F, Hd)
    mx = jnp.max(w0, axis=-1, keepdims=True)
    ex = jnp.exp(w0 - mx)
    inv_den = pl.reciprocal(jnp.sum(ex, axis=-1, keepdims=True), approx=True)
    W = jnp.sum(ex * inv_den, axis=0) * inv_g            # (F, Hd)

    # ---- Bw = mean_g (B_norm * weight_list): unrolled SMEM-scalar FMAs -------
    Bw = wl_ref[b, 0] * bnorm_ref[0]                     # (F, F)
    for g in range(1, G):
        Bw = Bw + wl_ref[b, g] * bnorm_ref[g]
    Bw = Bw * inv_g

    # ---- H = W^T @ Bw @ W  (contract feat dims; no explicit transpose) -------
    tmp = jax.lax.dot_general(W, Bw, (((0,), (0,)), ((), ())),
                              preferred_element_type=jnp.float32)   # (Hd, F)
    Hm = jnp.dot(tmp, W, preferred_element_type=jnp.float32)        # (Hd, Hd)

    # ---- H = H / H.sum(axis=0)  (column-wise normalize) ----------------------
    # NOTE: column sums are not guaranteed well away from zero (B_norm has
    # mixed sign); this mirrors the PyTorch reference exactly.
    Hm = Hm * pl.reciprocal(jnp.sum(Hm, axis=0, keepdims=True), approx=True)

    # ---- softmax over axis 0 --------------------------------------------------
    cmax = jnp.max(Hm, axis=0, keepdims=True)
    ce = jnp.exp(Hm - cmax)
    out_ref[...] = ce * pl.reciprocal(jnp.sum(ce, axis=0, keepdims=True),
                                      approx=True)


def cdrae_forward_batched(W_0, B_norm, weight_list):
    """Runs `batch` independent CDRAE forwards in a single pallas_call."""
    batch, G, F, Hd = W_0.shape
    return pl.pallas_call(
        cdrae_kernel,
        out_shape=jax.ShapeDtypeStruct((batch, Hd, Hd), jnp.float32),
        grid=(batch,),
        in_specs=[
            # batch dim squeezed out of the kernel view (None entry).
            pl.BlockSpec((None, G, F, Hd), lambda b: (b, 0, 0, 0)),
            pl.BlockSpec((None, G, F, F), lambda b: (b, 0, 0, 0)),
            # per-graph weights: whole (batch, G) array as SMEM scalars.
            pl.BlockSpec(memory_space=pltpu.MemorySpace.SMEM),
        ],
        out_specs=pl.BlockSpec((None, Hd, Hd), lambda b: (b, 0, 0)),
        compiler_params=pltpu.CompilerParams(
            dimension_semantics=("parallel",)),
    )(W_0, B_norm, weight_list)


def cdrae_forward(W_0, B_norm, weight_list):
    """Single CDRAE forward (batch of 1), matching the original module call."""
    return cdrae_forward_batched(W_0[None], B_norm[None], weight_list[None])[0]


def build_module_constants(A_hat, W_prior):
    """Mirrors CDRAE.__init__ (plain JAX glue). Accepts an optional leading
    batch dimension; stays in f32 throughout (no casts at the kernel boundary)."""
    d = A_hat.sum(axis=-2)[..., None]          # torch: sum(axis=1).view(G,-1,1)
    dT = A_hat.sum(axis=-1)[..., None]         # torch: sum(axis=2).view(G,-1,1)
    total = A_hat.sum(axis=(-2, -1))[..., None, None]
    B = A_hat - (d * dT) / total               # (d*dT) broadcasts along last dim
    B_norm = B / total
    W_0 = jax.nn.softmax(jnp.ones_like(W_prior) + W_prior, axis=-1)
    return W_0, B_norm


def reference_forward(W_0, B_norm, weight_list):
    """Numpy float64 reference of CDRAE.forward (single problem, 3-D inputs)."""
    W_0 = np.asarray(W_0, np.float64)
    B_norm = np.asarray(B_norm, np.float64)
    wl = np.asarray(weight_list, np.float64)

    def softmax(x, axis):
        m = x.max(axis=axis, keepdims=True)
        e = np.exp(x - m)
        return e / e.sum(axis=axis, keepdims=True)

    wf = softmax(W_0, axis=2).mean(axis=0)                          # (F, Hd)
    Bw = (B_norm * wl[:, None, None]).mean(axis=0)                  # (F, F)
    H = wf.T @ Bw @ wf
    H = H / H.sum(axis=0, keepdims=True)
    return softmax(H, axis=0)


if __name__ == "__main__":
    batch, graph_num, num_feat, num_hidden = 4, 3, 16, 32

    key = jax.random.PRNGKey(0)
    k1, k2, k3 = jax.random.split(key, 3)
    A_hat = (jax.random.uniform(k1, (batch, graph_num, num_feat, num_feat))
             + jnp.eye(num_feat))                                   # f32
    W_prior = 0.5 * jax.random.normal(
        k2, (batch, graph_num, num_feat, num_hidden))               # f32
    weight_list = jax.random.uniform(k3, (batch, graph_num)) + 0.5  # f32

    W_0, B_norm = build_module_constants(A_hat, W_prior)

    out_batched = jax.block_until_ready(
        cdrae_forward_batched(W_0, B_norm, weight_list))
    out_single = jax.block_until_ready(
        cdrae_forward(W_0[0], B_norm[0], weight_list[0]))

    assert out_batched.shape == (batch, num_hidden, num_hidden)
    assert out_single.shape == (num_hidden, num_hidden)
    assert bool(jnp.all(jnp.isfinite(out_batched)))
    assert bool(jnp.all(jnp.isfinite(out_single)))

    for b in range(batch):
        ref_b = reference_forward(W_0[b], B_norm[b], weight_list[b])
        np.testing.assert_allclose(np.asarray(out_batched[b]), ref_b,
                                   rtol=2e-2, atol=2e-2)
    ref_0 = reference_forward(W_0[0], B_norm[0], weight_list[0])
    np.testing.assert_allclose(np.asarray(out_single), ref_0,
                               rtol=2e-2, atol=2e-2)

    print("KERNEL_OK")
</pallas_src>

<mosaic_0001>
module attributes {stable_mosaic.version = 11 : i64} {
  func.func @cdrae_kernel(%arg0: i32, %arg1: memref<1x3x16x32xf32, #tpu.memory_space<vmem>>, %arg2: memref<1x3x16x16xf32, #tpu.memory_space<vmem>>, %arg3: memref<4x3xf32, #tpu.memory_space<smem>>, %arg4: memref<1x32x32xf32, #tpu.memory_space<vmem>>) attributes {dimension_semantics = [#tpu.dimension_semantics<parallel>], iteration_bounds = array<i64: 4>, scalar_prefetch = 0 : i64, scratch_operands = 0 : i64, tpu.core_type = #tpu.core_type<tc>, window_params = [{transform_indices = @transform_0, window_bounds = array<i64: 1, 3, 16, 32>}, {transform_indices = @transform_1, window_bounds = array<i64: 1, 3, 16, 16>}, {transform_indices = @transform_2, window_bounds = array<i64: 4, 3>}, {transform_indices = @transform_3, window_bounds = array<i64: 1, 32, 32>}]} {
    %c0 = arith.constant 0 : index
    %c0_0 = arith.constant 0 : index
    %c0_1 = arith.constant 0 : index
    %c0_2 = arith.constant 0 : index
    %0 = vector.load %arg1[%c0, %c0_0, %c0_1, %c0_2] : memref<1x3x16x32xf32, #tpu.memory_space<vmem>>, vector<1x3x16x32xf32>
    %1 = vector.shape_cast %0 : vector<1x3x16x32xf32> to vector<3x16x32xf32>
    %cst = arith.constant dense<0xFF800000> : vector<3x16xf32>
    %2 = vector.multi_reduction <maximumf>, %1, %cst [2] : vector<3x16x32xf32> to vector<3x16xf32>
    %3 = vector.shape_cast %2 : vector<3x16xf32> to vector<3x16x1xf32>
    %4 = vector.broadcast %3 : vector<3x16x1xf32> to vector<3x16x32xf32>
    %5 = arith.subf %1, %4 : vector<3x16x32xf32>
    %6 = math.exp %5 : vector<3x16x32xf32>
    %cst_3 = arith.constant dense<0.000000e+00> : vector<3x16xf32>
    %7 = vector.multi_reduction <add>, %6, %cst_3 [2] : vector<3x16x32xf32> to vector<3x16xf32>
    %8 = vector.shape_cast %7 : vector<3x16xf32> to vector<3x16x1xf32>
    %9 = tpu.reciprocal %8 {approx = true} : vector<3x16x1xf32> -> vector<3x16x1xf32>
    %10 = vector.broadcast %9 : vector<3x16x1xf32> to vector<3x16x32xf32>
    %11 = arith.mulf %6, %10 : vector<3x16x32xf32>
    %cst_4 = arith.constant dense<0.000000e+00> : vector<16x32xf32>
    %12 = vector.multi_reduction <add>, %11, %cst_4 [0] : vector<3x16x32xf32> to vector<16x32xf32>
    %cst_5 = arith.constant 0.333333343 : f32
    %13 = vector.broadcast %cst_5 : f32 to vector<16x32xf32>
    %14 = arith.mulf %12, %13 : vector<16x32xf32>
    %15 = arith.index_cast %arg0 : i32 to index
    %c0_6 = arith.constant 0 : index
    %16 = memref.load %arg3[%15, %c0_6] : memref<4x3xf32, #tpu.memory_space<smem>>
    %c0_7 = arith.constant 0 : index
    %c0_8 = arith.constant 0 : index
    %c0_9 = arith.constant 0 : index
    %c0_10 = arith.constant 0 : index
    %17 = vector.load %arg2[%c0_7, %c0_8, %c0_9, %c0_10] : memref<1x3x16x16xf32, #tpu.memory_space<vmem>>, vector<1x1x16x16xf32>
    %18 = vector.shape_cast %17 : vector<1x1x16x16xf32> to vector<16x16xf32>
    %19 = vector.broadcast %16 : f32 to vector<16x16xf32>
    %20 = arith.mulf %19, %18 : vector<16x16xf32>
    %21 = arith.index_cast %arg0 : i32 to index
    %c1 = arith.constant 1 : index
    %22 = memref.load %arg3[%21, %c1] : memref<4x3xf32, #tpu.memory_space<smem>>
    %c0_11 = arith.constant 0 : index
    %c1_12 = arith.constant 1 : index
    %c0_13 = arith.constant 0 : index
    %c0_14 = arith.constant 0 : index
    %23 = vector.load %arg2[%c0_11, %c1_12, %c0_13, %c0_14] : memref<1x3x16x16xf32, #tpu.memory_space<vmem>>, vector<1x1x16x16xf32>
    %24 = vector.shape_cast %23 : vector<1x1x16x16xf32> to vector<16x16xf32>
    %25 = vector.broadcast %22 : f32 to vector<16x16xf32>
    %26 = arith.mulf %25, %24 : vector<16x16xf32>
    %27 = arith.addf %20, %26 : vector<16x16xf32>
    %28 = arith.index_cast %arg0 : i32 to index
    %c2 = arith.constant 2 : index
    %29 = memref.load %arg3[%28, %c2] : memref<4x3xf32, #tpu.memory_space<smem>>
    %c0_15 = arith.constant 0 : index
    %c2_16 = arith.constant 2 : index
    %c0_17 = arith.constant 0 : index
    %c0_18 = arith.constant 0 : index
    %30 = vector.load %arg2[%c0_15, %c2_16, %c0_17, %c0_18] : memref<1x3x16x16xf32, #tpu.memory_space<vmem>>, vector<1x1x16x16xf32>
    %31 = vector.shape_cast %30 : vector<1x1x16x16xf32> to vector<16x16xf32>
    %32 = vector.broadcast %29 : f32 to vector<16x16xf32>
    %33 = arith.mulf %32, %31 : vector<16x16xf32>
    %34 = arith.addf %27, %33 : vector<16x16xf32>
    %cst_19 = arith.constant 0.333333343 : f32
    %35 = vector.broadcast %cst_19 : f32 to vector<16x16xf32>
    %36 = arith.mulf %34, %35 : vector<16x16xf32>
    %cst_20 = arith.constant dense<0.000000e+00> : vector<32x16xf32>
    %37 = tpu.matmul %14, %36, %cst_20 {dimension_numbers = #tpu.dot_dimension_numbers<[0], [0], [1], [1], [0, 1, 1, 1], [], []>} : vector<16x32xf32>, vector<16x16xf32>, vector<32x16xf32> -> vector<32x16xf32>
    %cst_21 = arith.constant dense<0.000000e+00> : vector<32x32xf32>
    %38 = tpu.matmul %37, %14, %cst_21 {dimension_numbers = #tpu.dot_dimension_numbers<[1], [0], [0], [1], [0, 0, 1, 1], [], []>} : vector<32x16xf32>, vector<16x32xf32>, vector<32x32xf32> -> vector<32x32xf32>
    %cst_22 = arith.constant dense<0.000000e+00> : vector<32xf32>
    %39 = vector.multi_reduction <add>, %38, %cst_22 [0] : vector<32x32xf32> to vector<32xf32>
    %40 = vector.shape_cast %39 : vector<32xf32> to vector<1x32xf32>
    %41 = tpu.reciprocal %40 {approx = true} : vector<1x32xf32> -> vector<1x32xf32>
    %42 = vector.broadcast %41 : vector<1x32xf32> to vector<32x32xf32>
    %43 = arith.mulf %38, %42 : vector<32x32xf32>
    %cst_23 = arith.constant dense<0xFF800000> : vector<32xf32>
    %44 = vector.multi_reduction <maximumf>, %43, %cst_23 [0] : vector<32x32xf32> to vector<32xf32>
    %45 = vector.shape_cast %44 : vector<32xf32> to vector<1x32xf32>
    %46 = vector.broadcast %45 : vector<1x32xf32> to vector<32x32xf32>
    %47 = arith.subf %43, %46 : vector<32x32xf32>
    %48 = math.exp %47 : vector<32x32xf32>
    %cst_24 = arith.constant dense<0.000000e+00> : vector<32xf32>
    %49 = vector.multi_reduction <add>, %48, %cst_24 [0] : vector<32x32xf32> to vector<32xf32>
    %50 = vector.shape_cast %49 : vector<32xf32> to vector<1x32xf32>
    %51 = tpu.reciprocal %50 {approx = true} : vector<1x32xf32> -> vector<1x32xf32>
    %52 = vector.broadcast %51 : vector<1x32xf32> to vector<32x32xf32>
    %53 = arith.mulf %48, %52 : vector<32x32xf32>
    %c0_25 = arith.constant 0 : index
    %c0_26 = arith.constant 0 : index
    %c0_27 = arith.constant 0 : index
    %54 = vector.load %arg4[%c0_25, %c0_26, %c0_27] : memref<1x32x32xf32, #tpu.memory_space<vmem>>, vector<1x32x32xf32>
    %55 = vector.shape_cast %54 : vector<1x32x32xf32> to vector<32x32xf32>
    %56 = vector.shape_cast %53 : vector<32x32xf32> to vector<1x32x32xf32>
    tpu.vector_store %arg4[%c0_25, %c0_26, %c0_27], %56 {strides = array<i32>} : memref<1x32x32xf32, #tpu.memory_space<vmem>>, vector<1x32x32xf32>,
    return
  }
  func.func @transform_0(%arg0: i32) -> (i32, i32, i32, i32) {
    %c0_i32 = arith.constant 0 : i32
    %c0_i32_0 = arith.constant 0 : i32
    %c0_i32_1 = arith.constant 0 : i32
    %c0_i32_2 = arith.constant 0 : i32
    return %arg0, %c0_i32, %c0_i32_0, %c0_i32_1 : i32, i32, i32, i32
  }
  func.func @transform_1(%arg0: i32) -> (i32, i32, i32, i32) {
    %c0_i32 = arith.constant 0 : i32
    %c0_i32_0 = arith.constant 0 : i32
    %c0_i32_1 = arith.constant 0 : i32
    %c0_i32_2 = arith.constant 0 : i32
    return %arg0, %c0_i32, %c0_i32_0, %c0_i32_1 : i32, i32, i32, i32
  }
  func.func @transform_2(%arg0: i32) -> (i32, i32) {
    %c0_i32 = arith.constant 0 : i32
    %c0_i32_0 = arith.constant 0 : i32
    %c0_i32_1 = arith.constant 0 : i32
    return %c0_i32, %c0_i32_0 : i32, i32
  }
  func.func @transform_3(%arg0: i32) -> (i32, i32, i32) {
    %c0_i32 = arith.constant 0 : i32
    %c0_i32_0 = arith.constant 0 : i32
    %c0_i32_1 = arith.constant 0 : i32
    return %arg0, %c0_i32, %c0_i32_0 : i32, i32, i32
  }
}

</mosaic_0001>

<bundles_post_ra>
// kernel: tpu_custom_call.1
= control target key start
LH: loop header
LB: loop body
LE: loop exit
PB: predicated region body
PF: predicated region fallthrough
CT: control target
= control target key end

     0   :  { %s1220_s0 = inlined_call_operand.hbm [shape: f32[4,3,16,32], index: 0, kind: input, shape index: {}]   ;;  %s1221_s1 = inlined_call_operand.hbm [shape: f32[4,3,16,16], index: 1, kind: input, shape index: {}]   ;;  %s1222_s2 = inlined_call_operand.hbm [shape: f32[4,3], index: 2, kind: input, shape index: {}]   ;;  %s1223_s3 = inlined_call_operand.hbm [shape: f32[4,32,32], index: 3, kind: output, shape index: {}]  }
   0x1   :  { %1225 = sst [smem:[#allocation15_spill]] %s1222_s2 }
   0x2   :  { %8 = vsyncpa [#allocation3], 0 }
   0x3   :  { %10 = vsyncpa [#allocation3 + $0x1], 0 }
   0x4   :  { %11 = vsyncpa [#allocation7], 0 }
   0x5   :  { %13 = vsyncpa [#allocation7 + $0x1], 0 }
   0x6   :  { %14 = vsyncpa [#allocation5], 0 }
   0x7   :  { %15 = vsyncpa [#allocation4], 0 }
   0x8   :  { %17 = vsyncpa [#allocation4 + $0x1], 0  ;;  %s981_s12 = smov 0   ;;  %s983_s13 = smov 0  }
   0x9   :  { %s985_s14 = smov 0   ;;  %s987_s15 = smov 0  }
   0xa LB: > { %s1002_s16 = sadd.s32 4294967295, %s954_s15   ;;  %s665_s17 = sadd.s32 4294967294, %s954_s15   ;;  %s954_s15 = sphi %s987_s15, %s1239_s15   ;;  %s950_s14 = sphi %s985_s14, %s1238_s14   ;;  %s946_s13 = sphi %s983_s13, %s1237_s13   ;;  %s942_s12 = sphi %s981_s12, %s1236_s12  }
   0xb   : > { %s1006_s18 = sadd.s32 1, %s954_s15   ;;  %s30_s19 = sadd.s32 1, %s950_s14 }
   0xc   : > { %s27_s20 = ssub.s32 %s954_s15, %s1006_s18  ;;  %p37_p0 = scmp.ne.s32.totalorder %s950_s14, %s946_s13 }
   0xd   : > { %p28_p1 = scmp.eq.s32.totalorder %s27_s20, 0  ;;  %p38_p2 = scmp.eq.s32.totalorder %s954_s15, 0 }
   0xe   : > { %p43_p3 = scmp.ne.s32.totalorder %s946_s13, %s942_s12  ;;  %p44_p4 = scmp.eq.s32.totalorder %s1002_s16, 0 }
   0xf   : > { %s1018_s21 = scalar_select %p28_p1, %s950_s14, %s30_s19  }
  0x10   : > { %p1020_p5 = por %p38_p2, %p37_p0  ;;  %p1026_p6 = por %p44_p4, %p43_p3 }
  0x11   : > { %1226 = sst [smem:[#allocation14_spill]] %s1018_s21  ;;  %p114_p7 = scmp.eq.s32.totalorder %s1002_s16, 3 }
  0x12   : > { %p120_p8 = scmp.eq.s32.totalorder %s665_s17, 3  ;;  %p666_p9 = scmp.ge.s32.totalorder %s954_s15, 1 }
  0x13   : > { %p127_p10 = scmp.lt.s32.totalorder %s954_s15, 5  ;;  %p1033_p11 = por %p114_p7, %p37_p0 }
  0x14   : > { %p1037_p12 = por %p120_p8, %p43_p3  ;;  %s1232_s2 = sld [smem:[#allocation15_spill]] }
  0x15   : > { %p1041_p13 = pnand %p666_p9, %p127_p10  ;;  %p728_p0 = scmp.lt.s32.totalorder %s954_s15, 4 }
  0x16   : > { %s1054_s30 = sand.u32 1, %s950_s14   ;;  %s956_s6 = smov [#allocation8]  }
  0x17   : > { %p712_p1 = pneg %p1041_p13  ;;  %p1058_p3 = pnand %p728_p0, %p1020_p5 }
  0x18   : > { %s1224_s5 = smul.u32 48, %s1054_s30  ;;  %s151_s20 = scalar_lea.sflag [#allocation3], %s1054_s30 }
  0x19   : > { %p713_p2 = pnand %p712_p1, %p44_p4  ;;  %s698_s7 = smul.u32 48, %s954_s15 }
  0x1a   : > { %s139_s29 = sshll.u32 %s1232_s2, 4  ;;  %s154_s8 = scalar_lea.vmem [#allocation2], %s1224_s5  ;;  %s140_s29 = int_to_ptr.hbm [resolvable:$true] %s139_s29 }
  0x1b   : > { %715 = dma.hbm_to_smem (!%p713_p2), %s140_s29, 64, %s956_s6, [#allocation5]  }
  0x1c   : > { %s162_s9 = sshll.u32 %s154_s8, 4  ;;  %s159_s17 = scalar_lea.hbm %s1220_s0, %s698_s7  ;;  %s163_s9 = int_to_ptr.vmem [resolvable:$true] %s162_s9 }
  0x1d   : > { %s160_s19 = sshll.u32 %s159_s17, 4  ;;  %p824_p7 = pneg %p1058_p3  ;;  %s161_s19 = int_to_ptr.hbm [resolvable:$true] %s160_s19 }
  0x1e   : > { %s820_s22 = sshra.s32 %s161_s19, 4  ;;  %s827_s6 = scalar_lea.hbm %s1220_s0, 192  ;;  %s821_s22 = int_to_ptr.hbm [resolvable:$true] %s820_s22 }
  0x1f   : > { %s822_s27 = scalar_lea.hbm %s821_s22, 48  ;;  %p828_p10 = scmp.lt.s32.totalorder %s821_s22, %s1220_s0 }
  0x20   : > { %p823_p5 = scmp.ne.s32.totalorder %s821_s22, %s822_s27  ;;  %p829_p1 = scmp.lt.s32.totalorder %s827_s6, %s822_s27 }
  0x22   : > { %p825_p8 = pnand %p824_p7, %p823_p5  ;;  %p830_p0 = por %p829_p1, %p828_p10 }
  0x24   : > { %p826_p9 = pneg %p825_p8 }
  0x26   : > { %p831_p2 = pnand %p830_p0, %p826_p9 }
  0x28   : > { %834 = shalt.err (!%p831_p2)
}
  0x29   : > { %s957_s11 = smov 128   ;;  %s958_s17 = smov 8  }
  0x2a   : > { %719 = dma.hbm_to_vmem [thread:$0]  (!%p1058_p3), %s161_s19, 768, %s163_s9, %s151_s20, %s957_s11, %s957_s11, %s958_s17  }
  0x2b   : > { %s181_s28 = scalar_lea.hbm %s1221_s1, %s698_s7  ;;  %s1234_s29 = smul.u32 48, %s1054_s30 }
  0x2c   : > { %s182_s22 = sshll.u32 %s181_s28, 4  ;;  %s173_s27 = scalar_lea.sflag [#allocation7], %s1054_s30  ;;  %s183_s22 = int_to_ptr.hbm [resolvable:$true] %s182_s22 }
  0x2d   : > { %s176_s21 = scalar_lea.vmem [#allocation6], %s1234_s29  ;;  %s850_s6 = sshra.s32 %s183_s22, 4  ;;  %s851_s6 = int_to_ptr.hbm [resolvable:$true] %s850_s6 }
  0x2e   : > { %s184_s8 = sshll.u32 %s176_s21, 4  ;;  %s852_s10 = scalar_lea.hbm %s851_s6, 48  ;;  %s185_s8 = int_to_ptr.vmem [resolvable:$true] %s184_s8 }
  0x2f   : > { %p853_p5 = scmp.ne.s32.totalorder %s851_s6, %s852_s10  ;;  %s857_s2 = scalar_lea.hbm %s1221_s1, 192 }
  0x30   : > { %p858_p10 = scmp.lt.s32.totalorder %s851_s6, %s1221_s1  ;;  %p859_p1 = scmp.lt.s32.totalorder %s857_s2, %s852_s10 }
  0x31   : > { %p855_p8 = pnand %p853_p5, %p824_p7 }
  0x32   : > { %p860_p0 = por %p859_p1, %p858_p10 }
  0x33   : > { %p856_p9 = pneg %p855_p8 }
  0x35   : > { %p861_p2 = pnand %p860_p0, %p856_p9 }
  0x37   : > { %864 = shalt.err (!%p861_p2)
}
  0x38   : > { %722 = dma.hbm_to_vmem [thread:$0]  (!%p1058_p3), %s183_s22, 768, %s185_s8, %s173_s27, %s957_s11, %s957_s11, %s958_s17  }
  0x39   : > { %196 = sbr.rel (%p1041_p13) target bundleno = 882 (0x372), region = 32  ;;  %s1103_s21 = sand.u32 (!%p1041_p13), 1, %s946_s13  }
  0x3a   : > { %s701_s30 = smul.u32 (!%p1041_p13), 48, %s1103_s21  ;;  %s199_s20 = scalar_lea.sflag (!%p1041_p13), [#allocation3], %s1103_s21 }
  0x3c   : > { %s202_s28 = scalar_lea.vmem (!%p1041_p13), [#allocation2], %s701_s30 }
  0x3e   : > { %925 = dma.done.wait (%p1026_p6), %s199_s20, 768  }
  0x3f   : > { %927 = vsyncadd (%p1026_p6), %s199_s20, 4294966528  ;;  %s209_s4 = scalar_lea.sflag [#allocation7], %s1103_s21  ;;  %s1112_s11 = scalar_lea.vmem [#allocation6], %s701_s30 }
  0x40   : > { %929 = dma.done.wait (%p1026_p6), %s209_s4, 768  }
  0x41   : > { %931 = vsyncadd (%p1026_p6), %s209_s4, 4294966528 }
  0x42   : > { %933 = dma.done.wait (%p44_p4), [#allocation5], 64  }
  0x43   : > { %935 = vsyncadd (%p44_p4), [#allocation5], 4294967232 }
  0x44   : > { %223 = sfence }
  0x45   : > { %v251_v0 = vld [vmem:[%s202_s28 + $0x20] sm:$0xff]  ;;  %vm253_vm0 = vcmask 261120   ;;  %v250_v1 = vld [vmem:[%s202_s28 + $0x18] sm:$0xff]  ;;  %v252_v6 = vld [vmem:[%s202_s28 + $0x28] sm:$0xff]  ;;  %s674_s23 = sshll.u32 %s1002_s16, 7  ;;  %vm393_vm1 = vcmask 130048  }
  0x46   : > { %v247_v2 = vld [vmem:[%s202_s28] sm:$0xff]  ;;  %v266_v3 = vsel %vm253_vm0, %v251_v0, -inf  ;;  %v263_v4 = vsel %vm253_vm0, %v250_v1, -inf  ;;  %v248_v7 = vld [vmem:[%s202_s28 + $0x8] sm:$0xff]  ;;  %v249_v8 = vld [vmem:[%s202_s28 + $0x10] sm:$0xff]  ;;  %v269_v9 = vsel %vm253_vm0, %v252_v6, -inf }
  0x47   : > { %v254_v5 = vsel %vm253_vm0, %v247_v2, -inf  ;;  %267 = vmax.xlane.f32.xlu1 %v266_v3  ;;  %264 = vmax.xlane.f32.xlu2 %v263_v4  ;;  %v257_v10 = vsel %vm253_vm0, %v248_v7, -inf  ;;  %v260_v11 = vsel %vm253_vm0, %v249_v8, -inf  ;;  %s339_s26 = sadd.s32 1, %s674_s23  ;;  %s349_s17 = sadd.s32 2, %s674_s23  ;;  %v335_v44 = vld [vmem:[%s1112_s11 + $0x8] sm:$0xff] }
  0x48   : > { %255 = vmax.xlane.f32.xlu0 %v254_v5  ;;  %s333_s29 = sld [smem:[#allocation8 + %s674_s23]]  ;;  %v676_v46 = vld [vmem:[%s1112_s11 + $0x18] sm:$0xff]  ;;  %v678_v50 = vld [vmem:[%s1112_s11 + $0x28] sm:$0xff]  ;;  %v334_v52 = vld [vmem:[%s1112_s11] sm:$0xff]  ;;  %s673_s27 = sshll.u32 %s1103_s21, 5 }
  0x49   : > { %s340_s8 = sld [smem:[#allocation8 + %s339_s26]]  ;;  %v675_v53 = vld [vmem:[%s1112_s11 + $0x10] sm:$0xff]  ;;  %v677_v57 = vld [vmem:[%s1112_s11 + $0x20] sm:$0xff]  ;;  %s692_s6 = sshll.u32 %s1002_s16, 5 }
  0x4a   : > { %s350_s22 = sld [smem:[#allocation8 + %s349_s17]]  ;;  %s553_s19 = scalar_lea.hbm %s1223_s3, %s692_s6 }
  0x4b   : > { %s246_s2 = scalar_lea.vmem [#allocation9], %s673_s27  ;;  %s556_s7 = sshll.u32 %s553_s19, 4  ;;  %s557_s7 = int_to_ptr.hbm [resolvable:$true] %s556_s7 }
  0x4c   : > { %s554_s5 = sshll.u32 %s246_s2, 4  ;;  %s542_s16 = scalar_lea.sflag [#allocation4], %s1103_s21  ;;  %s555_s5 = int_to_ptr.vmem [resolvable:$true] %s554_s5 }
  0x4d   : > { %s894_s30 = sshra.s32 %s557_s7, 4  ;;  %s900_s11 = scalar_lea.hbm %s1223_s3, 128  ;;  %s895_s30 = int_to_ptr.hbm [resolvable:$true] %s894_s30 }
  0x4e   : > { %v336_v45 = vstv %s333_s29  ;;  %s896_s20 = scalar_lea.hbm %s895_s30, 32  ;;  %p901_p3 = scmp.lt.s32.totalorder %s895_s30, %s1223_s3 }
  0x4f   : > { %270 = vmax.xlane.f32.xlu2 %v269_v9  ;;  %258 = vmax.xlane.f32.xlu1 %v257_v10  ;;  %v344_v47 = vstv %s340_s8  ;;  %v338_v48 = vmul.f32 %v336_v45, %v335_v44  ;;  %v337_v55 = vmul.f32 %v336_v45, %v334_v52  ;;  %p897_p4 = scmp.ne.s32.totalorder %s895_s30, %s896_s20  ;;  %p902_p7 = scmp.lt.s32.totalorder %s900_s11, %s896_s20 }
  0x50   : > { %261 = vmax.xlane.f32.xlu0 %v260_v11  ;;  %v346_v49 = vmul.f32 %v676_v46, %v344_v47  ;;  %v354_v51 = vstv %s350_s22  ;;  %v345_v56 = vmul.f32 %v675_v53, %v344_v47 }
  0x51   : > { %v356_v54 = vmul.f32 %v678_v50, %v354_v51  ;;  %v355_v59 = vmul.f32 %v677_v57, %v354_v51  ;;  %p898_p6 = pnand %p897_p4, %p1033_p11  ;;  %p903_p5 = por %p902_p7, %p901_p3 }
  0x52   : > { %v348_v58 = vadd.f32 %v346_v49, %v338_v48  ;;  %v347_v61 = vadd.f32 %v345_v56, %v337_v55 }
  0x53   : > { %p899_p13 = pneg %p898_p6 }
  0x54   : > { %v358_v62 = vadd.f32 %v356_v54, %v348_v58 }
  0x55   : > { %p904_p8 = pnand %p903_p5, %p899_p13 }
  0xba   : > { %v268_v12 = vpop.xlane.xlu1 %267  ;;  %v265_v13 = vpop.xlane.xlu2 %264 }
  0xbb   : > { %v276_v14 = vsub.f32 %v251_v0, %v268_v12  ;;  %v256_v15 = vpop.xlane.xlu0 %255  ;;  %v275_v31 = vsub.f32 %v250_v1, %v265_v13  ;;  %v357_v0 = vadd.f32 %v355_v59, %v347_v61 }
  0xbc   : > { %v272_v16 = vsub.f32 %v247_v2, %v256_v15  ;;  %v360_v2 = vmul.f32 0.33333334, %v358_v62 }
  0xbd   : > { %v286_v17 = vmul.f32 1.442695, %v276_v14  ;;  %v284_v33 = vmul.f32 1.442695, %v275_v31  ;;  %v359_v4 = vmul.f32 0.33333334, %v357_v0 }
  0xbe   : > { %v278_v18 = vmul.f32 1.442695, %v272_v16  ;;  %420 = vmatpush.msra.mxu0 %v360_v2  ;;  %693 = vmatpush.msra.mxu2 %v360_v2 }
  0xbf   : > { %769 = vpow2.f32 %v286_v17 }
  0xc0   : > { %771 = vpow2.f32 %v278_v18  ;;  %421 = vmatpush.msra.mxu0 %v359_v4  ;;  %694 = vmatpush.msra.mxu2 %v359_v4 }
  0xc2   : > { %v271_v19 = vpop.xlane.xlu2 %270  ;;  %v259_v20 = vpop.xlane.xlu1 %258 }
  0xc3   : > { %v277_v21 = vsub.f32 %v252_v6, %v271_v19  ;;  %v273_v22 = vsub.f32 %v248_v7, %v259_v20  ;;  %v262_v23 = vpop.xlane.xlu0 %261 }
  0xc4   : > { %v274_v24 = vsub.f32 %v249_v8, %v262_v23 }
  0xc5   : > { %v1128_v25 = vpop.eup %769  ;;  %v288_v26 = vmul.f32 1.442695, %v277_v21  ;;  %v280_v27 = vmul.f32 1.442695, %v273_v22 }
  0xc6   : > { %v282_v28 = vmul.f32 1.442695, %v274_v24  ;;  %v302_v29 = vsel %vm253_vm0, %v1128_v25, 0.0  ;;  %v772_v30 = vpop.eup %771 }
  0xc7   : > { %773 = vpow2.f32 %v288_v26  ;;  %303 = vadd.xlane.f32.xlu2 %v302_v29  ;;  %v290_v32 = vsel %vm253_vm0, %v772_v30, 0.0 }
  0xc8   : > { %775 = vpow2.f32 %v280_v27  ;;  %291 = vadd.xlane.f32.xlu0 %v290_v32 }
  0xc9   : > { %777 = vpow2.f32 %v282_v28 }
  0xca   : > { %779 = vpow2.f32 %v284_v33 }
  0xcd   : > { %v1133_v34 = vpop.eup %773 }
  0xce   : > { %v1135_v35 = vpop.eup %775  ;;  %v305_v36 = vsel %vm253_vm0, %v1133_v34, 0.0 }
  0xcf   : > { %v778_v37 = vpop.eup %777  ;;  %306 = vadd.xlane.f32.xlu2 %v305_v36  ;;  %v293_v38 = vsel %vm253_vm0, %v1135_v35, 0.0 }
  0xd0   : > { %v296_v39 = vsel %vm253_vm0, %v778_v37, 0.0  ;;  %294 = vadd.xlane.f32.xlu0 %v293_v38  ;;  %v1142_v40 = vpop.eup %779 }
  0xd1   : > { %297 = vadd.xlane.f32.xlu1 %v296_v39  ;;  %v299_v41 = vsel %vm253_vm0, %v1142_v40, 0.0 }
  0xd9   : > { %300 = vadd.xlane.f32.xlu1 %v299_v41 }
 0x13a   : > { %v304_v43 = vpop.xlane.xlu2 %303 }
 0x13b   : > { %v292_v42 = vpop.xlane.xlu0 %291 }
 0x13c   : > { %781 = vrcp.f32 %v292_v42 }
 0x13d   : > { %783 = vrcp.f32 %v304_v43 }
 0x142   : > { %v782_v1 = vpop.eup %781  ;;  %v307_v3 = vpop.xlane.xlu2 %306 }
 0x143   : > { %v295_v63 = vpop.xlane.xlu0 %294  ;;  %v784_v5 = vpop.eup %783  ;;  %v314_v6 = vmul.f32 %v782_v1, %v772_v30 }
 0x144   : > { %v298_v60 = vpop.xlane.xlu1 %297  ;;  %v318_v10 = vmul.f32 %v784_v5, %v1128_v25 }
 0x145   : > { %785 = vrcp.f32 %v298_v60  ;;  %v320_v11 = vsel %vm253_vm0, %v314_v6, 0.0 }
 0x146   : > { %787 = vrcp.f32 %v295_v63  ;;  %v323_v15 = vsel %vm253_vm0, %v318_v10, 0.0 }
 0x147   : > { %789 = vrcp.f32 %v307_v3 }
 0x14b   : > { %v786_v7 = vpop.eup %785 }
 0x14c   : > { %v316_v8 = vmul.f32 %v786_v7, %v778_v37  ;;  %v301_v9 = vpop.xlane.xlu1 %300  ;;  %v788_v13 = vpop.eup %787 }
 0x14d   : > { %791 = vrcp.f32 %v301_v9  ;;  %v790_v16 = vpop.eup %789  ;;  %v315_v18 = vmul.f32 %v788_v13, %v1135_v35 }
 0x14e   : > { %v321_v12 = vsel %vm253_vm0, %v316_v8, 0.0  ;;  %v319_v21 = vmul.f32 %v790_v16, %v1133_v34 }
 0x14f   : > { %v322_v14 = vadd.f32 %v321_v12, %v320_v11  ;;  %v325_v23 = vsel %vm253_vm0, %v315_v18, 0.0 }
 0x150   : > { %v328_v26 = vsel %vm253_vm0, %v319_v21, 0.0 }
 0x151   : > { %v324_v17 = vadd.f32 %v323_v15, %v322_v14 }
 0x153   : > { %v792_v19 = vpop.eup %791  ;;  %v330_v20 = vmul.f32 0.33333334, %v324_v17 }
 0x154   : > { %v317_v22 = vmul.f32 %v792_v19, %v1142_v40 }
 0x155   : > { %361 = vxpose.xlu0.b32.start [1/2] (short) (narrow) %v330_v20, 32 }
 0x156   : > { %v326_v24 = vsel %vm253_vm0, %v317_v22, 0.0 }
 0x157   : > { %v327_v25 = vadd.f32 %v326_v24, %v325_v23 }
 0x159   : > { %v329_v27 = vadd.f32 %v328_v26, %v327_v25 }
 0x15b   : > { %v331_v28 = vmul.f32 0.33333334, %v329_v27 }
 0x15d   : > { %362 = vxpose.xlu0.b32.end [2/2] (short) (narrow) %v331_v28, 32  ;;  %461 = vmatpush.msra.mxu1 %v331_v28 }
 0x15e   : > { %695 = vmatpush.msra.mxu3 %v331_v28 }
 0x15f   : > { %462 = vmatpush.msra.mxu1 %v330_v20 }
 0x160   : > { %696 = vmatpush.msra.mxu3 %v330_v20 }
 0x1f9   : > { %v377_v29 = vpop.trf.xlu0 }
 0x1fa   : > { %679 = vmatmul.msk.f32.vlgmr.msra.gmra.mxu0 %vm393_vm1, %v377_v29 }
 0x201   : > { %v378_v30 = vpop.trf.xlu0 }
 0x202   : > { %680 = vmatmul.msk.f32.gmra.mxu0 %vm393_vm1, %v378_v30 }
 0x209   : > { %v379_v31 = vpop.trf.xlu0 }
 0x20a   : > { %681 = vmatmul.msk.f32.vlgmr.msra.gmra.mxu2 %vm393_vm1, %v379_v31 }
 0x211   : > { %v380_v32 = vpop.trf.xlu0 }
 0x212   : > { %682 = vmatmul.msk.f32.gmra.mxu2 %vm393_vm1, %v380_v32 }
 0x277   : > { %v423_v33 = vpop.f32.mrf.mxu0 }
 0x278   : > { %683 = vmatmul.msk.f32.vlgmr.msra.gmra.mxu1 %vm393_vm1, %v423_v33 }
 0x27f   : > { %v426_v34 = vpop.f32.mrf.mxu0 }
 0x280   : > { %684 = vmatmul.msk.f32.gmra.mxu1 %vm393_vm1, %v426_v34 }
 0x28d   : > { %v429_v35 = vpop.f32.mrf.mxu2 }
 0x28e   : > { %685 = vmatmul.msk.f32.vlgmr.msra.gmra.mxu3 %vm393_vm1, %v429_v35 }
 0x295   : > { %v432_v36 = vpop.f32.mrf.mxu2 }
 0x296   : > { %686 = vmatmul.msk.f32.gmra.mxu3 %vm393_vm1, %v432_v36 }
 0x2f5   : > { %v464_v37 = vpop.f32.mrf.mxu1 }
 0x2f6   : > { %v476_v41 = vsel %vm253_vm0, %v464_v37, 0.0 }
 0x2fd   : > { %v467_v38 = vpop.f32.mrf.mxu1 }
 0x2fe   : > { %v477_v40 = vsel %vm253_vm0, %v467_v38, 0.0 }
 0x2ff   : > { %v478_v43 = vadd.f32 %v477_v40, %v476_v41 }
 0x311   : > { %v470_v39 = vpop.f32.mrf.mxu3 }
 0x312   : > { %v479_v42 = vsel %vm253_vm0, %v470_v39, 0.0 }
 0x313   : > { %v480_v44 = vadd.f32 %v479_v42, %v478_v43 }
 0x319   : > { %v473_v45 = vpop.f32.mrf.mxu3 }
 0x31a   : > { %v481_v46 = vsel %vm253_vm0, %v473_v45, 0.0 }
 0x31b   : > { %v482_v47 = vadd.f32 %v481_v46, %v480_v44 }
 0x31d   : > { %v483_v48 = vrot.slane %v482_v47, 4 }
 0x31f   : > { %v484_v49 = vadd.f32 %v483_v48, %v482_v47 }
 0x321   : > { %v485_v50 = vrot.slane %v484_v49, 2 }
 0x323   : > { %v486_v51 = vadd.f32 %v485_v50, %v484_v49 }
 0x325   : > { %v487_v52 = vrot.slane %v486_v51, 1 }
 0x327   : > { %v488_v53 = vadd.f32 %v487_v52, %v486_v51 }
 0x329   : > { %793 = vrcp.f32 %v488_v53 }
 0x32f   : > { %v794_v54 = vpop.eup %793 }
 0x330   : > { %v490_v55 = vmul.f32 %v794_v54, %v464_v37  ;;  %v491_v56 = vmul.f32 %v794_v54, %v467_v38  ;;  %v492_v57 = vmul.f32 %v794_v54, %v470_v39  ;;  %v493_v58 = vmul.f32 %v794_v54, %v473_v45 }
 0x332   : > { %v494_v59 = vsel %vm253_vm0, %v490_v55, -inf  ;;  %v495_v60 = vsel %vm253_vm0, %v491_v56, -inf  ;;  %v496_v61 = vsel %vm253_vm0, %v492_v57, -inf  ;;  %v497_v62 = vsel %vm253_vm0, %v493_v58, -inf }
 0x333   : > { %v498_v63 = vmax.f32 %v494_v59, %v495_v60  ;;  %v499_v0 = vmax.f32 %v496_v61, %v497_v62 }
 0x335   : > { %v500_v1 = vmax.f32 %v498_v63, %v499_v0 }
 0x337   : > { %v501_v2 = vrot.slane %v500_v1, 4 }
 0x339   : > { %v502_v3 = vmax.f32 %v500_v1, %v501_v2 }
 0x33b   : > { %v503_v4 = vrot.slane %v502_v3, 2 }
 0x33d   : > { %v504_v5 = vmax.f32 %v502_v3, %v503_v4 }
 0x33f   : > { %v505_v6 = vrot.slane %v504_v5, 1 }
 0x341   : > { %v506_v7 = vmax.f32 %v504_v5, %v505_v6 }
 0x343   : > { %v507_v8 = vsub.f32 %v490_v55, %v506_v7  ;;  %v508_v9 = vsub.f32 %v491_v56, %v506_v7  ;;  %v509_v10 = vsub.f32 %v492_v57, %v506_v7  ;;  %v510_v11 = vsub.f32 %v493_v58, %v506_v7 }
 0x345   : > { %v511_v12 = vmul.f32 1.442695, %v507_v8  ;;  %v513_v13 = vmul.f32 1.442695, %v508_v9  ;;  %v515_v14 = vmul.f32 1.442695, %v509_v10 }
 0x346   : > { %v517_v15 = vmul.f32 1.442695, %v510_v11 }
 0x347   : > { %795 = vpow2.f32 %v511_v12 }
 0x348   : > { %797 = vpow2.f32 %v513_v13 }
 0x349   : > { %799 = vpow2.f32 %v515_v14 }
 0x34a   : > { %801 = vpow2.f32 %v517_v15 }
 0x34d   : > { %v796_v16 = vpop.eup %795 }
 0x34e   : > { %v798_v17 = vpop.eup %797  ;;  %v519_v18 = vsel %vm253_vm0, %v796_v16, 0.0 }
 0x34f   : > { %v800_v19 = vpop.eup %799  ;;  %v520_v20 = vsel %vm253_vm0, %v798_v17, 0.0 }
 0x350   : > { %v802_v21 = vpop.eup %801  ;;  %v521_v22 = vadd.f32 %v520_v20, %v519_v18  ;;  %v522_v23 = vsel %vm253_vm0, %v800_v19, 0.0 }
 0x351   : > { %v524_v25 = vsel %vm253_vm0, %v802_v21, 0.0 }
 0x352   : > { %v523_v24 = vadd.f32 %v522_v23, %v521_v22 }
 0x354   : > { %v525_v26 = vadd.f32 %v524_v25, %v523_v24 }
 0x356   : > { %v526_v27 = vrot.slane %v525_v26, 4 }
 0x358   : > { %v527_v28 = vadd.f32 %v526_v27, %v525_v26 }
 0x35a   : > { %v528_v29 = vrot.slane %v527_v28, 2 }
 0x35c   : > { %v529_v30 = vadd.f32 %v528_v29, %v527_v28 }
 0x35e   : > { %v530_v31 = vrot.slane %v529_v30, 1 }
 0x360   : > { %v531_v32 = vadd.f32 %v530_v31, %v529_v30 }
 0x362   : > { %803 = vrcp.f32 %v531_v32 }
 0x368   : > { %v804_v33 = vpop.eup %803 }
 0x369   : > { %v533_v34 = vmul.f32 %v804_v33, %v796_v16  ;;  %v534_v35 = vmul.f32 %v804_v33, %v798_v17  ;;  %v536_v36 = vmul.f32 %v804_v33, %v802_v21  ;;  %v535_v37 = vmul.f32 %v804_v33, %v800_v19 }
 0x36b   : > { %540 = vst.msk [vmem:[%s246_s2 + $0x18] sm:$0xff] %vm253_vm0, %v536_v36 }
 0x36c   : > { %537 = vst.msk [vmem:[%s246_s2] sm:$0xff] %vm253_vm0, %v533_v34 }
 0x36d   : > { %538 = vst.msk [vmem:[%s246_s2 + $0x8] sm:$0xff] %vm253_vm0, %v534_v35 }
 0x36e   : > { %539 = vst.msk [vmem:[%s246_s2 + $0x10] sm:$0xff] %vm253_vm0, %v535_v37 }
 0x36f   : > { %907 = shalt.err (!%p904_p8)
}
 0x370   : > { %s959_s21 = smov 128   ;;  %s960_s17 = smov 8  }
 0x371   : > { %710 = dma.vmem_to_hbm [thread:$0]  (%p1033_p11), %s555_s5, 512, %s557_s7, %s542_s16, %s959_s21, %s959_s21, %s960_s17  }
 0x372 PF: > { %p730_p9 = scmp.ge.s32.totalorder %s954_s15, 2  ;;  %s571_s29 = sand.u32 1, %s942_s12  }
 0x373   : > { %s572_s8 = scalar_lea.sflag [#allocation4], %s571_s29 }
 0x374   : > { %p724_p10 = pnand %p730_p9, %p1037_p12 }
 0x376   : > { %p725_p1 = pneg %p724_p10 }
 0x378   : > { %937 = dma.done.wait (%p725_p1), %s572_s8, 512  }
 0x379   : > { %939 = vsyncadd (%p725_p1), %s572_s8, 4294966784  ;;  %s1235_s22 = sld [smem:[#allocation14_spill]]  ;;  %p20_p0 = scmp.ge.s32.totalorder %s1006_s18, 6  }
 0x37a   : > { %s1236_s12 = smov %s946_s13  ;;  %s1237_s13 = smov %s950_s14 }
 0x37b   : > { %s1239_s15 = smov %s1006_s18  ;;  %22 = sbr.rel (!%p20_p0) target bundleno = 10 (0xa), region = 97 }
 0x37f   : > { %s1238_s14 = smov %s1235_s22 }
 0x380   :  { %578 = vsyncpa [#allocation3], 1 }
 0x381   :  { %580 = vsyncpa [#allocation3 + $0x1], 1 }
 0x382   :  { %581 = vsyncpa [#allocation7], 1 }
 0x383   :  { %583 = vsyncpa [#allocation7 + $0x1], 1 }
 0x384   :  { %584 = vsyncpa [#allocation4], 1 }
 0x385   :  { %586 = vsyncpa [#allocation4 + $0x1], 1 }
 0x386   :  { %587 = vsyncpa [#allocation5], 1 }
 0x387   :  { %589 = vsyncpa [#allocation5 + $0x1], 1 }

</bundles_post_ra>
